<compile_context>
chip_gen: v7x
topology: tpu7x:2x2x1
jax: 0.10.0
libtpu: 0.0.40
codegen_flags: <defaults>
</compile_context>

<pallas_src>
import functools

import jax
import jax.numpy as jnp
from jax.experimental import pallas as pl
from jax.experimental.pallas import tpu as pltpu


def _lstm_kernel(*refs, num_layers, hidden, chunk_t, b_blk, num_chunks):
    if num_layers > 1:
        (xp_ref, whh_ref, wih_ref, b_ref, fcw_ref, fcb_ref,
         out_ref, h_ref, c_ref, rec_ref) = refs
    else:
        (xp_ref, whh_ref, fcw_ref, fcb_ref,
         out_ref, h_ref, c_ref, rec_ref) = refs
        wih_ref = b_ref = None

    L, H, Bb = num_layers, hidden, b_blk
    G4 = 4 * H
    ct = pl.program_id(1)

    # ---- init persistent state at the first time-chunk of this batch block --
    @pl.when(ct == 0)
    def _():
        h_ref[...] = jnp.zeros_like(h_ref)
        c_ref[...] = jnp.zeros_like(c_ref)
        rec_ref[0] = jnp.zeros((Bb, G4), jnp.float32)
        for l in range(1, L):
            # h == 0  =>  rec_l = 0 @ W_hh_l + b_l = b_l
            rec_ref[l] = jnp.broadcast_to(b_ref[l - 1], (Bb, G4))

    # ---- hoist weight loads & bias broadcasts (once per chunk) --------------
    whh = [whh_ref[l] for l in range(L)]                       # (H, 4H)
    wih = [wih_ref[l - 1] for l in range(1, L)]                # (H, 4H)
    bias = [jnp.broadcast_to(b_ref[l - 1], (Bb, G4)) for l in range(1, L)]
    fcw = fcw_ref[...]                                         # (1, H)
    fcb = fcb_ref[...]                                         # (1, 1)

    hs = [h_ref[l] for l in range(L)]
    cs = [c_ref[l] for l in range(L)]
    recs = [rec_ref[l] for l in range(L)]

    def cell(gates, c_prev):
        # Full-vreg activations (2 EUP pushes cover all 4 gates), slice after.
        sig = jax.nn.sigmoid(gates)
        th = jnp.tanh(gates)
        i = sig[:, 0 * H:1 * H]
        f = sig[:, 1 * H:2 * H]
        g = th[:, 2 * H:3 * H]
        o = sig[:, 3 * H:4 * H]
        c = f * c_prev + i * g
        h = o * jnp.tanh(c)
        return h, c

    # ---- wavefront schedule over (t, layer) inside the chunk -----------------
    # Wave s handles (t = s - l, layer l).  All dependencies come from wave
    # s-1, so the gate matmuls of one wave are mutually independent.  Layers
    # are visited in DECREASING order so h_{l-1}(t) is consumed before layer
    # l-1 overwrites it with h_{l-1}(t+1) in the same wave.  chunk_t is small,
    # so the static unroll stays within instruction-memory / live-range budget
    # (for large chunks, switch the wave loop to lax.fori_loop(unroll=4-8)).
    for s in range(chunk_t + L - 1):
        for l in range(L - 1, -1, -1):
            t = s - l
            if t < 0 or t >= chunk_t:
                continue
            if l == 0:
                gates = xp_ref[t] + recs[0]          # input proj precomputed
            else:
                gates = jnp.dot(hs[l - 1], wih[l - 1],
                                preferred_element_type=jnp.float32) + recs[l]
            hs[l], cs[l] = cell(gates, cs[l])
            # Eager recurrent projection for this layer's *next* step: it only
            # needs hs[l], so it overlaps with the rest of the wavefront and is
            # ready (bias included) before the wave that consumes it.
            rec = jnp.dot(hs[l], whh[l], preferred_element_type=jnp.float32)
            recs[l] = rec if l == 0 else rec + bias[l - 1]

    # ---- persist state for the next time-chunk ------------------------------
    for l in range(L):
        h_ref[l] = hs[l]
        c_ref[l] = cs[l]
        rec_ref[l] = recs[l]

    # ---- FC head on the final hidden state (VPU mul + lane reduction) -------
    @pl.when(ct == num_chunks - 1)
    def _():
        out_ref[...] = (jnp.sum(hs[L - 1] * fcw, axis=-1, keepdims=True)
                        + fcb).astype(out_ref.dtype)


def lstm_forward(x, params, *, hidden, num_layers, chunk_t=4,
                 num_batch_blocks=1):
    """x: (B, T, input_size) f32 -> (B, 1) f32 (matches the PyTorch module)."""
    wih0_t, b0, whh, wih_rest, b_rest, fc_w, fc_b = params
    B, T, _ = x.shape
    H, G4 = hidden, 4 * hidden
    NB = num_batch_blocks
    assert B % NB == 0, (B, NB)
    Bb = B // NB
    assert T % chunk_t == 0, (T, chunk_t)
    NC = T // chunk_t

    # Layer-0 input projection for ALL timesteps as a plain (parallel) XLA
    # GEMM in the wrapper, bias folded in.  (NB, T, Bb, 4H), streamed per chunk.
    x_r = x.reshape(NB, Bb, T, -1).transpose(0, 2, 1, 3)      # (NB, T, Bb, D)
    xp = jnp.einsum('ntbd,df->ntbf', x_r, wih0_t,
                    preferred_element_type=jnp.float32) + b0

    kernel = functools.partial(_lstm_kernel, num_layers=num_layers, hidden=H,
                               chunk_t=chunk_t, b_blk=Bb, num_chunks=NC)

    def const_spec(a):
        nd = a.ndim
        return pl.BlockSpec(a.shape, lambda nb, ct, _nd=nd: (0,) * _nd)

    in_specs = [
        pl.BlockSpec((None, chunk_t, Bb, G4), lambda nb, ct: (nb, ct, 0, 0)),
        const_spec(whh),
    ]
    inputs = [xp, whh]
    if num_layers > 1:
        in_specs += [const_spec(wih_rest), const_spec(b_rest)]
        inputs += [wih_rest, b_rest]
    in_specs += [const_spec(fc_w), const_spec(fc_b)]
    inputs += [fc_w, fc_b]

    out = pl.pallas_call(
        kernel,
        out_shape=jax.ShapeDtypeStruct((NB, Bb, 1), jnp.float32),
        grid=(NB, NC),
        in_specs=in_specs,
        out_specs=pl.BlockSpec((None, Bb, 1), lambda nb, ct: (nb, 0, 0)),
        scratch_shapes=[pltpu.VMEM((num_layers, Bb, H), jnp.float32),   # h
                        pltpu.VMEM((num_layers, Bb, H), jnp.float32),   # c
                        pltpu.VMEM((num_layers, Bb, G4), jnp.float32)], # rec
        compiler_params=pltpu.CompilerParams(
            dimension_semantics=("parallel", "arbitrary"),
            vmem_limit_bytes=32 * 1024 * 1024),
    )(*inputs)
    return out.reshape(B, 1)


def init_raw_params(key, input_size, hidden, num_layers):
    """Raw nn.LSTM / nn.Linear shaped weights, default-init U(-1/sqrt(H), 1/sqrt(H))."""
    bound = 1.0 / (hidden ** 0.5)
    keys = jax.random.split(key, 4 * num_layers + 2)
    layers = []
    for l in range(num_layers):
        in_dim = input_size if l == 0 else hidden
        w_ih = jax.random.uniform(keys[4 * l + 0], (4 * hidden, in_dim),
                                  minval=-bound, maxval=bound)
        w_hh = jax.random.uniform(keys[4 * l + 1], (4 * hidden, hidden),
                                  minval=-bound, maxval=bound)
        b_ih = jax.random.uniform(keys[4 * l + 2], (4 * hidden,),
                                  minval=-bound, maxval=bound)
        b_hh = jax.random.uniform(keys[4 * l + 3], (4 * hidden,),
                                  minval=-bound, maxval=bound)
        layers.append((w_ih, w_hh, b_ih, b_hh))
    fc_w = jax.random.uniform(keys[-2], (1, hidden), minval=-bound, maxval=bound)
    fc_b = jax.random.uniform(keys[-1], (1,), minval=-bound, maxval=bound)
    return layers, fc_w, fc_b


def pack_params(raw, input_size, hidden, num_layers):
    """Arrange raw weights for wrapper + kernel.

    Returns:
      wih0_t   : (D, 4H)          layer-0 input weight (transposed, wrapper GEMM)
      b0       : (1, 4H)          layer-0 b_ih + b_hh (folded into xp)
      whh      : (L, H, 4H)       recurrent weights, transposed
      wih_rest : (L-1, H, 4H)     input weights of layers >= 1 (or None)
      b_rest   : (L-1, 1, 4H)     b_ih + b_hh of layers >= 1 (or None)
      fc_w     : (1, H), fc_b : (1, 1)
    """
    layers, fc_w, fc_b = raw
    wih0_t = layers[0][0].T.astype(jnp.float32)
    b0 = (layers[0][2] + layers[0][3])[None, :].astype(jnp.float32)
    whh = jnp.stack([layers[l][1].T for l in range(num_layers)]).astype(jnp.float32)
    if num_layers > 1:
        wih_rest = jnp.stack([layers[l][0].T
                              for l in range(1, num_layers)]).astype(jnp.float32)
        b_rest = jnp.stack([(layers[l][2] + layers[l][3])[None, :]
                            for l in range(1, num_layers)]).astype(jnp.float32)
    else:
        wih_rest, b_rest = None, None
    return (wih0_t, b0, whh, wih_rest, b_rest,
            fc_w.astype(jnp.float32), fc_b[None, :].astype(jnp.float32))


def lstm_reference(x, raw, *, hidden, num_layers):
    """Pure-JAX reference mirroring torch.nn.LSTM(batch_first=True) + Linear."""
    layers, fc_w, fc_b = raw
    B, T, _ = x.shape
    h = [jnp.zeros((B, hidden), jnp.float32) for _ in range(num_layers)]
    c = [jnp.zeros((B, hidden), jnp.float32) for _ in range(num_layers)]
    for t in range(T):
        inp = x[:, t, :]
        for l in range(num_layers):
            w_ih, w_hh, b_ih, b_hh = layers[l]
            gates = inp @ w_ih.T + h[l] @ w_hh.T + b_ih + b_hh
            i = jax.nn.sigmoid(gates[:, 0 * hidden:1 * hidden])
            f = jax.nn.sigmoid(gates[:, 1 * hidden:2 * hidden])
            g = jnp.tanh(gates[:, 2 * hidden:3 * hidden])
            o = jax.nn.sigmoid(gates[:, 3 * hidden:4 * hidden])
            c[l] = f * c[l] + i * g
            h[l] = o * jnp.tanh(c[l])
            inp = h[l]
    return h[-1] @ fc_w.T + fc_b


if __name__ == "__main__":
    BATCH, SEQ, INPUT_SIZE, HIDDEN, NUM_LAYERS = 8, 8, 4, 32, 2

    key = jax.random.PRNGKey(0)
    kx, kp = jax.random.split(key)
    x = jax.random.normal(kx, (BATCH, SEQ, INPUT_SIZE), dtype=jnp.float32)

    raw = init_raw_params(kp, INPUT_SIZE, HIDDEN, NUM_LAYERS)
    params = pack_params(raw, INPUT_SIZE, HIDDEN, NUM_LAYERS)

    # chunk_t=4 -> 2 time-chunks (exercises state carry across the grid);
    # num_batch_blocks=2 -> exercises the "parallel" batch axis (both v7x TCs).
    out = lstm_forward(x, params, hidden=HIDDEN, num_layers=NUM_LAYERS,
                       chunk_t=4, num_batch_blocks=2)
    out = jax.block_until_ready(out)

    ref = lstm_reference(x, raw, hidden=HIDDEN, num_layers=NUM_LAYERS)
    assert out.shape == (BATCH, 1), out.shape
    assert jnp.allclose(out, ref, atol=1e-4, rtol=1e-4), (out, ref)

    print("KERNEL_OK")
</pallas_src>

<mosaic_0001>
module attributes {stable_mosaic.version = 11 : i64} {
  func.func @_lstm_kernel(%arg0: i32, %arg1: i32, %arg2: memref<1x4x4x128xf32, #tpu.memory_space<vmem>>, %arg3: memref<2x32x128xf32, #tpu.memory_space<vmem>>, %arg4: memref<1x32x128xf32, #tpu.memory_space<vmem>>, %arg5: memref<1x1x128xf32, #tpu.memory_space<vmem>>, %arg6: memref<1x32xf32, #tpu.memory_space<vmem>>, %arg7: memref<1x1xf32, #tpu.memory_space<vmem>>, %arg8: memref<1x4x1xf32, #tpu.memory_space<vmem>>, %arg9: memref<2x4x32xf32, #tpu.memory_space<vmem>>, %arg10: memref<2x4x32xf32, #tpu.memory_space<vmem>>, %arg11: memref<2x4x128xf32, #tpu.memory_space<vmem>>) attributes {dimension_semantics = [#tpu.dimension_semantics<parallel>, #tpu.dimension_semantics<arbitrary>], iteration_bounds = array<i64: 2, 2>, scalar_prefetch = 0 : i64, scratch_operands = 3 : i64, tpu.core_type = #tpu.core_type<tc>, window_params = [{transform_indices = @transform_0, window_bounds = array<i64: 1, 4, 4, 128>}, {pipeline_mode = #tpu.pipeline_mode<synchronous>, transform_indices = @transform_1, window_bounds = array<i64: 2, 32, 128>}, {pipeline_mode = #tpu.pipeline_mode<synchronous>, transform_indices = @transform_2, window_bounds = array<i64: 1, 32, 128>}, {pipeline_mode = #tpu.pipeline_mode<synchronous>, transform_indices = @transform_3, window_bounds = array<i64: 1, 1, 128>}, {pipeline_mode = #tpu.pipeline_mode<synchronous>, transform_indices = @transform_4, window_bounds = array<i64: 1, 32>}, {pipeline_mode = #tpu.pipeline_mode<synchronous>, transform_indices = @transform_5, window_bounds = array<i64: 1, 1>}, {transform_indices = @transform_6, window_bounds = array<i64: 1, 4, 1>}]} {
    %c0_i32 = arith.constant 0 : i32
    %0 = arith.cmpi eq, %arg1, %c0_i32 : i32
    %1 = arith.extui %0 : i1 to i32
    %c0_i32_0 = arith.constant 0 : i32
    %2 = arith.cmpi ne, %1, %c0_i32_0 : i32
    scf.if %2 {
      %cst_79 = arith.constant 0.000000e+00 : f32
      %196 = vector.broadcast %cst_79 : f32 to vector<2x4x32xf32>
      %c0_80 = arith.constant 0 : index
      %c0_81 = arith.constant 0 : index
      %c0_82 = arith.constant 0 : index
      %197 = vector.load %arg9[%c0_80, %c0_81, %c0_82] : memref<2x4x32xf32, #tpu.memory_space<vmem>>, vector<2x4x32xf32>
      tpu.vector_store %arg9[%c0_80, %c0_81, %c0_82], %196 {strides = array<i32>} : memref<2x4x32xf32, #tpu.memory_space<vmem>>, vector<2x4x32xf32>,
      %cst_83 = arith.constant 0.000000e+00 : f32
      %198 = vector.broadcast %cst_83 : f32 to vector<2x4x32xf32>
      %c0_84 = arith.constant 0 : index
      %c0_85 = arith.constant 0 : index
      %c0_86 = arith.constant 0 : index
      %199 = vector.load %arg10[%c0_84, %c0_85, %c0_86] : memref<2x4x32xf32, #tpu.memory_space<vmem>>, vector<2x4x32xf32>
      tpu.vector_store %arg10[%c0_84, %c0_85, %c0_86], %198 {strides = array<i32>} : memref<2x4x32xf32, #tpu.memory_space<vmem>>, vector<2x4x32xf32>,
      %cst_87 = arith.constant 0.000000e+00 : f32
      %200 = vector.broadcast %cst_87 : f32 to vector<4x128xf32>
      %c0_88 = arith.constant 0 : index
      %c0_89 = arith.constant 0 : index
      %c0_90 = arith.constant 0 : index
      %201 = vector.load %arg11[%c0_88, %c0_89, %c0_90] : memref<2x4x128xf32, #tpu.memory_space<vmem>>, vector<1x4x128xf32>
      %202 = vector.shape_cast %201 : vector<1x4x128xf32> to vector<4x128xf32>
      %203 = vector.shape_cast %200 : vector<4x128xf32> to vector<1x4x128xf32>
      tpu.vector_store %arg11[%c0_88, %c0_89, %c0_90], %203 {strides = array<i32>} : memref<2x4x128xf32, #tpu.memory_space<vmem>>, vector<1x4x128xf32>,
      %c0_91 = arith.constant 0 : index
      %c0_92 = arith.constant 0 : index
      %c0_93 = arith.constant 0 : index
      %204 = vector.load %arg5[%c0_91, %c0_92, %c0_93] : memref<1x1x128xf32, #tpu.memory_space<vmem>>, vector<1x1x128xf32>
      %205 = vector.shape_cast %204 : vector<1x1x128xf32> to vector<1x128xf32>
      %206 = vector.shape_cast %205 : vector<1x128xf32> to vector<1x128xf32>
      %207 = vector.broadcast %206 : vector<1x128xf32> to vector<4x128xf32>
      %c1_94 = arith.constant 1 : index
      %c0_95 = arith.constant 0 : index
      %c0_96 = arith.constant 0 : index
      %208 = vector.load %arg11[%c1_94, %c0_95, %c0_96] : memref<2x4x128xf32, #tpu.memory_space<vmem>>, vector<1x4x128xf32>
      %209 = vector.shape_cast %208 : vector<1x4x128xf32> to vector<4x128xf32>
      %210 = vector.shape_cast %207 : vector<4x128xf32> to vector<1x4x128xf32>
      tpu.vector_store %arg11[%c1_94, %c0_95, %c0_96], %210 {strides = array<i32>} : memref<2x4x128xf32, #tpu.memory_space<vmem>>, vector<1x4x128xf32>,
    } else {
    }
    %c0 = arith.constant 0 : index
    %c0_1 = arith.constant 0 : index
    %c0_2 = arith.constant 0 : index
    %3 = vector.load %arg3[%c0, %c0_1, %c0_2] : memref<2x32x128xf32, #tpu.memory_space<vmem>>, vector<1x32x128xf32>
    %4 = vector.shape_cast %3 : vector<1x32x128xf32> to vector<32x128xf32>
    %c1 = arith.constant 1 : index
    %c0_3 = arith.constant 0 : index
    %c0_4 = arith.constant 0 : index
    %5 = vector.load %arg3[%c1, %c0_3, %c0_4] : memref<2x32x128xf32, #tpu.memory_space<vmem>>, vector<1x32x128xf32>
    %6 = vector.shape_cast %5 : vector<1x32x128xf32> to vector<32x128xf32>
    %c0_5 = arith.constant 0 : index
    %c0_6 = arith.constant 0 : index
    %c0_7 = arith.constant 0 : index
    %7 = vector.load %arg4[%c0_5, %c0_6, %c0_7] : memref<1x32x128xf32, #tpu.memory_space<vmem>>, vector<1x32x128xf32>
    %8 = vector.shape_cast %7 : vector<1x32x128xf32> to vector<32x128xf32>
    %c0_8 = arith.constant 0 : index
    %c0_9 = arith.constant 0 : index
    %c0_10 = arith.constant 0 : index
    %9 = vector.load %arg5[%c0_8, %c0_9, %c0_10] : memref<1x1x128xf32, #tpu.memory_space<vmem>>, vector<1x1x128xf32>
    %10 = vector.shape_cast %9 : vector<1x1x128xf32> to vector<1x128xf32>
    %11 = vector.shape_cast %10 : vector<1x128xf32> to vector<1x128xf32>
    %12 = vector.broadcast %11 : vector<1x128xf32> to vector<4x128xf32>
    %c0_11 = arith.constant 0 : index
    %c0_12 = arith.constant 0 : index
    %13 = vector.load %arg6[%c0_11, %c0_12] : memref<1x32xf32, #tpu.memory_space<vmem>>, vector<1x32xf32>
    %c0_13 = arith.constant 0 : index
    %c0_14 = arith.constant 0 : index
    %14 = vector.load %arg7[%c0_13, %c0_14] : memref<1x1xf32, #tpu.memory_space<vmem>>, vector<1x1xf32>
    %c0_15 = arith.constant 0 : index
    %c0_16 = arith.constant 0 : index
    %c0_17 = arith.constant 0 : index
    %15 = vector.load %arg10[%c0_15, %c0_16, %c0_17] : memref<2x4x32xf32, #tpu.memory_space<vmem>>, vector<1x4x32xf32>
    %16 = vector.shape_cast %15 : vector<1x4x32xf32> to vector<4x32xf32>
    %c1_18 = arith.constant 1 : index
    %c0_19 = arith.constant 0 : index
    %c0_20 = arith.constant 0 : index
    %17 = vector.load %arg10[%c1_18, %c0_19, %c0_20] : memref<2x4x32xf32, #tpu.memory_space<vmem>>, vector<1x4x32xf32>
    %18 = vector.shape_cast %17 : vector<1x4x32xf32> to vector<4x32xf32>
    %c0_21 = arith.constant 0 : index
    %c0_22 = arith.constant 0 : index
    %c0_23 = arith.constant 0 : index
    %19 = vector.load %arg11[%c0_21, %c0_22, %c0_23] : memref<2x4x128xf32, #tpu.memory_space<vmem>>, vector<1x4x128xf32>
    %20 = vector.shape_cast %19 : vector<1x4x128xf32> to vector<4x128xf32>
    %c1_24 = arith.constant 1 : index
    %c0_25 = arith.constant 0 : index
    %c0_26 = arith.constant 0 : index
    %21 = vector.load %arg11[%c1_24, %c0_25, %c0_26] : memref<2x4x128xf32, #tpu.memory_space<vmem>>, vector<1x4x128xf32>
    %22 = vector.shape_cast %21 : vector<1x4x128xf32> to vector<4x128xf32>
    %c0_27 = arith.constant 0 : index
    %c0_28 = arith.constant 0 : index
    %c0_29 = arith.constant 0 : index
    %c0_30 = arith.constant 0 : index
    %23 = vector.load %arg2[%c0_27, %c0_28, %c0_29, %c0_30] : memref<1x4x4x128xf32, #tpu.memory_space<vmem>>, vector<1x1x4x128xf32>
    %24 = vector.shape_cast %23 : vector<1x1x4x128xf32> to vector<4x128xf32>
    %25 = arith.addf %24, %20 : vector<4x128xf32>
    %26 = arith.negf %25 : vector<4x128xf32>
    %27 = math.exp %26 : vector<4x128xf32>
    %cst = arith.constant 1.000000e+00 : f32
    %28 = vector.broadcast %cst : f32 to vector<4x128xf32>
    %29 = arith.addf %28, %27 : vector<4x128xf32>
    %30 = arith.divf %28, %29 : vector<4x128xf32>
    %31 = math.tanh %25 : vector<4x128xf32>
    %32 = vector.extract_strided_slice %30 {offsets = [0, 0], sizes = [4, 32], strides = [1, 1]} : vector<4x128xf32> to vector<4x32xf32>
    %33 = vector.extract_strided_slice %30 {offsets = [0, 32], sizes = [4, 32], strides = [1, 1]} : vector<4x128xf32> to vector<4x32xf32>
    %34 = vector.extract_strided_slice %31 {offsets = [0, 64], sizes = [4, 32], strides = [1, 1]} : vector<4x128xf32> to vector<4x32xf32>
    %35 = vector.extract_strided_slice %30 {offsets = [0, 96], sizes = [4, 32], strides = [1, 1]} : vector<4x128xf32> to vector<4x32xf32>
    %36 = arith.mulf %33, %16 : vector<4x32xf32>
    %37 = arith.mulf %32, %34 : vector<4x32xf32>
    %38 = arith.addf %36, %37 : vector<4x32xf32>
    %39 = math.tanh %38 : vector<4x32xf32>
    %40 = arith.mulf %35, %39 : vector<4x32xf32>
    %cst_31 = arith.constant dense<0.000000e+00> : vector<4x128xf32>
    %41 = tpu.matmul %40, %4, %cst_31 {dimension_numbers = #tpu.dot_dimension_numbers<[1], [0], [0], [1], [0, 0, 1, 1], [], []>} : vector<4x32xf32>, vector<32x128xf32>, vector<4x128xf32> -> vector<4x128xf32>
    %cst_32 = arith.constant dense<0.000000e+00> : vector<4x128xf32>
    %42 = tpu.matmul %40, %8, %cst_32 {dimension_numbers = #tpu.dot_dimension_numbers<[1], [0], [0], [1], [0, 0, 1, 1], [], []>} : vector<4x32xf32>, vector<32x128xf32>, vector<4x128xf32> -> vector<4x128xf32>
    %43 = arith.addf %42, %22 : vector<4x128xf32>
    %44 = arith.negf %43 : vector<4x128xf32>
    %45 = math.exp %44 : vector<4x128xf32>
    %cst_33 = arith.constant 1.000000e+00 : f32
    %46 = vector.broadcast %cst_33 : f32 to vector<4x128xf32>
    %47 = arith.addf %46, %45 : vector<4x128xf32>
    %48 = arith.divf %46, %47 : vector<4x128xf32>
    %49 = math.tanh %43 : vector<4x128xf32>
    %50 = vector.extract_strided_slice %48 {offsets = [0, 0], sizes = [4, 32], strides = [1, 1]} : vector<4x128xf32> to vector<4x32xf32>
    %51 = vector.extract_strided_slice %48 {offsets = [0, 32], sizes = [4, 32], strides = [1, 1]} : vector<4x128xf32> to vector<4x32xf32>
    %52 = vector.extract_strided_slice %49 {offsets = [0, 64], sizes = [4, 32], strides = [1, 1]} : vector<4x128xf32> to vector<4x32xf32>
    %53 = vector.extract_strided_slice %48 {offsets = [0, 96], sizes = [4, 32], strides = [1, 1]} : vector<4x128xf32> to vector<4x32xf32>
    %54 = arith.mulf %51, %18 : vector<4x32xf32>
    %55 = arith.mulf %50, %52 : vector<4x32xf32>
    %56 = arith.addf %54, %55 : vector<4x32xf32>
    %57 = math.tanh %56 : vector<4x32xf32>
    %58 = arith.mulf %53, %57 : vector<4x32xf32>
    %cst_34 = arith.constant dense<0.000000e+00> : vector<4x128xf32>
    %59 = tpu.matmul %58, %6, %cst_34 {dimension_numbers = #tpu.dot_dimension_numbers<[1], [0], [0], [1], [0, 0, 1, 1], [], []>} : vector<4x32xf32>, vector<32x128xf32>, vector<4x128xf32> -> vector<4x128xf32>
    %60 = arith.addf %59, %12 : vector<4x128xf32>
    %c0_35 = arith.constant 0 : index
    %c1_36 = arith.constant 1 : index
    %c0_37 = arith.constant 0 : index
    %c0_38 = arith.constant 0 : index
    %61 = vector.load %arg2[%c0_35, %c1_36, %c0_37, %c0_38] : memref<1x4x4x128xf32, #tpu.memory_space<vmem>>, vector<1x1x4x128xf32>
    %62 = vector.shape_cast %61 : vector<1x1x4x128xf32> to vector<4x128xf32>
    %63 = arith.addf %62, %41 : vector<4x128xf32>
    %64 = arith.negf %63 : vector<4x128xf32>
    %65 = math.exp %64 : vector<4x128xf32>
    %cst_39 = arith.constant 1.000000e+00 : f32
    %66 = vector.broadcast %cst_39 : f32 to vector<4x128xf32>
    %67 = arith.addf %66, %65 : vector<4x128xf32>
    %68 = arith.divf %66, %67 : vector<4x128xf32>
    %69 = math.tanh %63 : vector<4x128xf32>
    %70 = vector.extract_strided_slice %68 {offsets = [0, 0], sizes = [4, 32], strides = [1, 1]} : vector<4x128xf32> to vector<4x32xf32>
    %71 = vector.extract_strided_slice %68 {offsets = [0, 32], sizes = [4, 32], strides = [1, 1]} : vector<4x128xf32> to vector<4x32xf32>
    %72 = vector.extract_strided_slice %69 {offsets = [0, 64], sizes = [4, 32], strides = [1, 1]} : vector<4x128xf32> to vector<4x32xf32>
    %73 = vector.extract_strided_slice %68 {offsets = [0, 96], sizes = [4, 32], strides = [1, 1]} : vector<4x128xf32> to vector<4x32xf32>
    %74 = arith.mulf %71, %38 : vector<4x32xf32>
    %75 = arith.mulf %70, %72 : vector<4x32xf32>
    %76 = arith.addf %74, %75 : vector<4x32xf32>
    %77 = math.tanh %76 : vector<4x32xf32>
    %78 = arith.mulf %73, %77 : vector<4x32xf32>
    %cst_40 = arith.constant dense<0.000000e+00> : vector<4x128xf32>
    %79 = tpu.matmul %78, %4, %cst_40 {dimension_numbers = #tpu.dot_dimension_numbers<[1], [0], [0], [1], [0, 0, 1, 1], [], []>} : vector<4x32xf32>, vector<32x128xf32>, vector<4x128xf32> -> vector<4x128xf32>
    %cst_41 = arith.constant dense<0.000000e+00> : vector<4x128xf32>
    %80 = tpu.matmul %78, %8, %cst_41 {dimension_numbers = #tpu.dot_dimension_numbers<[1], [0], [0], [1], [0, 0, 1, 1], [], []>} : vector<4x32xf32>, vector<32x128xf32>, vector<4x128xf32> -> vector<4x128xf32>
    %81 = arith.addf %80, %60 : vector<4x128xf32>
    %82 = arith.negf %81 : vector<4x128xf32>
    %83 = math.exp %82 : vector<4x128xf32>
    %cst_42 = arith.constant 1.000000e+00 : f32
    %84 = vector.broadcast %cst_42 : f32 to vector<4x128xf32>
    %85 = arith.addf %84, %83 : vector<4x128xf32>
    %86 = arith.divf %84, %85 : vector<4x128xf32>
    %87 = math.tanh %81 : vector<4x128xf32>
    %88 = vector.extract_strided_slice %86 {offsets = [0, 0], sizes = [4, 32], strides = [1, 1]} : vector<4x128xf32> to vector<4x32xf32>
    %89 = vector.extract_strided_slice %86 {offsets = [0, 32], sizes = [4, 32], strides = [1, 1]} : vector<4x128xf32> to vector<4x32xf32>
    %90 = vector.extract_strided_slice %87 {offsets = [0, 64], sizes = [4, 32], strides = [1, 1]} : vector<4x128xf32> to vector<4x32xf32>
    %91 = vector.extract_strided_slice %86 {offsets = [0, 96], sizes = [4, 32], strides = [1, 1]} : vector<4x128xf32> to vector<4x32xf32>
    %92 = arith.mulf %89, %56 : vector<4x32xf32>
    %93 = arith.mulf %88, %90 : vector<4x32xf32>
    %94 = arith.addf %92, %93 : vector<4x32xf32>
    %95 = math.tanh %94 : vector<4x32xf32>
    %96 = arith.mulf %91, %95 : vector<4x32xf32>
    %cst_43 = arith.constant dense<0.000000e+00> : vector<4x128xf32>
    %97 = tpu.matmul %96, %6, %cst_43 {dimension_numbers = #tpu.dot_dimension_numbers<[1], [0], [0], [1], [0, 0, 1, 1], [], []>} : vector<4x32xf32>, vector<32x128xf32>, vector<4x128xf32> -> vector<4x128xf32>
    %98 = arith.addf %97, %12 : vector<4x128xf32>
    %c0_44 = arith.constant 0 : index
    %c2 = arith.constant 2 : index
    %c0_45 = arith.constant 0 : index
    %c0_46 = arith.constant 0 : index
    %99 = vector.load %arg2[%c0_44, %c2, %c0_45, %c0_46] : memref<1x4x4x128xf32, #tpu.memory_space<vmem>>, vector<1x1x4x128xf32>
    %100 = vector.shape_cast %99 : vector<1x1x4x128xf32> to vector<4x128xf32>
    %101 = arith.addf %100, %79 : vector<4x128xf32>
    %102 = arith.negf %101 : vector<4x128xf32>
    %103 = math.exp %102 : vector<4x128xf32>
    %cst_47 = arith.constant 1.000000e+00 : f32
    %104 = vector.broadcast %cst_47 : f32 to vector<4x128xf32>
    %105 = arith.addf %104, %103 : vector<4x128xf32>
    %106 = arith.divf %104, %105 : vector<4x128xf32>
    %107 = math.tanh %101 : vector<4x128xf32>
    %108 = vector.extract_strided_slice %106 {offsets = [0, 0], sizes = [4, 32], strides = [1, 1]} : vector<4x128xf32> to vector<4x32xf32>
    %109 = vector.extract_strided_slice %106 {offsets = [0, 32], sizes = [4, 32], strides = [1, 1]} : vector<4x128xf32> to vector<4x32xf32>
    %110 = vector.extract_strided_slice %107 {offsets = [0, 64], sizes = [4, 32], strides = [1, 1]} : vector<4x128xf32> to vector<4x32xf32>
    %111 = vector.extract_strided_slice %106 {offsets = [0, 96], sizes = [4, 32], strides = [1, 1]} : vector<4x128xf32> to vector<4x32xf32>
    %112 = arith.mulf %109, %76 : vector<4x32xf32>
    %113 = arith.mulf %108, %110 : vector<4x32xf32>
    %114 = arith.addf %112, %113 : vector<4x32xf32>
    %115 = math.tanh %114 : vector<4x32xf32>
    %116 = arith.mulf %111, %115 : vector<4x32xf32>
    %cst_48 = arith.constant dense<0.000000e+00> : vector<4x128xf32>
    %117 = tpu.matmul %116, %4, %cst_48 {dimension_numbers = #tpu.dot_dimension_numbers<[1], [0], [0], [1], [0, 0, 1, 1], [], []>} : vector<4x32xf32>, vector<32x128xf32>, vector<4x128xf32> -> vector<4x128xf32>
    %cst_49 = arith.constant dense<0.000000e+00> : vector<4x128xf32>
    %118 = tpu.matmul %116, %8, %cst_49 {dimension_numbers = #tpu.dot_dimension_numbers<[1], [0], [0], [1], [0, 0, 1, 1], [], []>} : vector<4x32xf32>, vector<32x128xf32>, vector<4x128xf32> -> vector<4x128xf32>
    %119 = arith.addf %118, %98 : vector<4x128xf32>
    %120 = arith.negf %119 : vector<4x128xf32>
    %121 = math.exp %120 : vector<4x128xf32>
    %cst_50 = arith.constant 1.000000e+00 : f32
    %122 = vector.broadcast %cst_50 : f32 to vector<4x128xf32>
    %123 = arith.addf %122, %121 : vector<4x128xf32>
    %124 = arith.divf %122, %123 : vector<4x128xf32>
    %125 = math.tanh %119 : vector<4x128xf32>
    %126 = vector.extract_strided_slice %124 {offsets = [0, 0], sizes = [4, 32], strides = [1, 1]} : vector<4x128xf32> to vector<4x32xf32>
    %127 = vector.extract_strided_slice %124 {offsets = [0, 32], sizes = [4, 32], strides = [1, 1]} : vector<4x128xf32> to vector<4x32xf32>
    %128 = vector.extract_strided_slice %125 {offsets = [0, 64], sizes = [4, 32], strides = [1, 1]} : vector<4x128xf32> to vector<4x32xf32>
    %129 = vector.extract_strided_slice %124 {offsets = [0, 96], sizes = [4, 32], strides = [1, 1]} : vector<4x128xf32> to vector<4x32xf32>
    %130 = arith.mulf %127, %94 : vector<4x32xf32>
    %131 = arith.mulf %126, %128 : vector<4x32xf32>
    %132 = arith.addf %130, %131 : vector<4x32xf32>
    %133 = math.tanh %132 : vector<4x32xf32>
    %134 = arith.mulf %129, %133 : vector<4x32xf32>
    %cst_51 = arith.constant dense<0.000000e+00> : vector<4x128xf32>
    %135 = tpu.matmul %134, %6, %cst_51 {dimension_numbers = #tpu.dot_dimension_numbers<[1], [0], [0], [1], [0, 0, 1, 1], [], []>} : vector<4x32xf32>, vector<32x128xf32>, vector<4x128xf32> -> vector<4x128xf32>
    %136 = arith.addf %135, %12 : vector<4x128xf32>
    %c0_52 = arith.constant 0 : index
    %c3 = arith.constant 3 : index
    %c0_53 = arith.constant 0 : index
    %c0_54 = arith.constant 0 : index
    %137 = vector.load %arg2[%c0_52, %c3, %c0_53, %c0_54] : memref<1x4x4x128xf32, #tpu.memory_space<vmem>>, vector<1x1x4x128xf32>
    %138 = vector.shape_cast %137 : vector<1x1x4x128xf32> to vector<4x128xf32>
    %139 = arith.addf %138, %117 : vector<4x128xf32>
    %140 = arith.negf %139 : vector<4x128xf32>
    %141 = math.exp %140 : vector<4x128xf32>
    %cst_55 = arith.constant 1.000000e+00 : f32
    %142 = vector.broadcast %cst_55 : f32 to vector<4x128xf32>
    %143 = arith.addf %142, %141 : vector<4x128xf32>
    %144 = arith.divf %142, %143 : vector<4x128xf32>
    %145 = math.tanh %139 : vector<4x128xf32>
    %146 = vector.extract_strided_slice %144 {offsets = [0, 0], sizes = [4, 32], strides = [1, 1]} : vector<4x128xf32> to vector<4x32xf32>
    %147 = vector.extract_strided_slice %144 {offsets = [0, 32], sizes = [4, 32], strides = [1, 1]} : vector<4x128xf32> to vector<4x32xf32>
    %148 = vector.extract_strided_slice %145 {offsets = [0, 64], sizes = [4, 32], strides = [1, 1]} : vector<4x128xf32> to vector<4x32xf32>
    %149 = vector.extract_strided_slice %144 {offsets = [0, 96], sizes = [4, 32], strides = [1, 1]} : vector<4x128xf32> to vector<4x32xf32>
    %150 = arith.mulf %147, %114 : vector<4x32xf32>
    %151 = arith.mulf %146, %148 : vector<4x32xf32>
    %152 = arith.addf %150, %151 : vector<4x32xf32>
    %153 = math.tanh %152 : vector<4x32xf32>
    %154 = arith.mulf %149, %153 : vector<4x32xf32>
    %cst_56 = arith.constant dense<0.000000e+00> : vector<4x128xf32>
    %155 = tpu.matmul %154, %4, %cst_56 {dimension_numbers = #tpu.dot_dimension_numbers<[1], [0], [0], [1], [0, 0, 1, 1], [], []>} : vector<4x32xf32>, vector<32x128xf32>, vector<4x128xf32> -> vector<4x128xf32>
    %cst_57 = arith.constant dense<0.000000e+00> : vector<4x128xf32>
    %156 = tpu.matmul %154, %8, %cst_57 {dimension_numbers = #tpu.dot_dimension_numbers<[1], [0], [0], [1], [0, 0, 1, 1], [], []>} : vector<4x32xf32>, vector<32x128xf32>, vector<4x128xf32> -> vector<4x128xf32>
    %157 = arith.addf %156, %136 : vector<4x128xf32>
    %158 = arith.negf %157 : vector<4x128xf32>
    %159 = math.exp %158 : vector<4x128xf32>
    %cst_58 = arith.constant 1.000000e+00 : f32
    %160 = vector.broadcast %cst_58 : f32 to vector<4x128xf32>
    %161 = arith.addf %160, %159 : vector<4x128xf32>
    %162 = arith.divf %160, %161 : vector<4x128xf32>
    %163 = math.tanh %157 : vector<4x128xf32>
    %164 = vector.extract_strided_slice %162 {offsets = [0, 0], sizes = [4, 32], strides = [1, 1]} : vector<4x128xf32> to vector<4x32xf32>
    %165 = vector.extract_strided_slice %162 {offsets = [0, 32], sizes = [4, 32], strides = [1, 1]} : vector<4x128xf32> to vector<4x32xf32>
    %166 = vector.extract_strided_slice %163 {offsets = [0, 64], sizes = [4, 32], strides = [1, 1]} : vector<4x128xf32> to vector<4x32xf32>
    %167 = vector.extract_strided_slice %162 {offsets = [0, 96], sizes = [4, 32], strides = [1, 1]} : vector<4x128xf32> to vector<4x32xf32>
    %168 = arith.mulf %165, %132 : vector<4x32xf32>
    %169 = arith.mulf %164, %166 : vector<4x32xf32>
    %170 = arith.addf %168, %169 : vector<4x32xf32>
    %171 = math.tanh %170 : vector<4x32xf32>
    %172 = arith.mulf %167, %171 : vector<4x32xf32>
    %cst_59 = arith.constant dense<0.000000e+00> : vector<4x128xf32>
    %173 = tpu.matmul %172, %6, %cst_59 {dimension_numbers = #tpu.dot_dimension_numbers<[1], [0], [0], [1], [0, 0, 1, 1], [], []>} : vector<4x32xf32>, vector<32x128xf32>, vector<4x128xf32> -> vector<4x128xf32>
    %174 = arith.addf %173, %12 : vector<4x128xf32>
    %c0_60 = arith.constant 0 : index
    %c0_61 = arith.constant 0 : index
    %c0_62 = arith.constant 0 : index
    %175 = vector.load %arg9[%c0_60, %c0_61, %c0_62] : memref<2x4x32xf32, #tpu.memory_space<vmem>>, vector<1x4x32xf32>
    %176 = vector.shape_cast %175 : vector<1x4x32xf32> to vector<4x32xf32>
    %177 = vector.shape_cast %154 : vector<4x32xf32> to vector<1x4x32xf32>
    tpu.vector_store %arg9[%c0_60, %c0_61, %c0_62], %177 {strides = array<i32>} : memref<2x4x32xf32, #tpu.memory_space<vmem>>, vector<1x4x32xf32>,
    %c0_63 = arith.constant 0 : index
    %c0_64 = arith.constant 0 : index
    %c0_65 = arith.constant 0 : index
    %178 = vector.load %arg10[%c0_63, %c0_64, %c0_65] : memref<2x4x32xf32, #tpu.memory_space<vmem>>, vector<1x4x32xf32>
    %179 = vector.shape_cast %178 : vector<1x4x32xf32> to vector<4x32xf32>
    %180 = vector.shape_cast %152 : vector<4x32xf32> to vector<1x4x32xf32>
    tpu.vector_store %arg10[%c0_63, %c0_64, %c0_65], %180 {strides = array<i32>} : memref<2x4x32xf32, #tpu.memory_space<vmem>>, vector<1x4x32xf32>,
    %c0_66 = arith.constant 0 : index
    %c0_67 = arith.constant 0 : index
    %c0_68 = arith.constant 0 : index
    %181 = vector.load %arg11[%c0_66, %c0_67, %c0_68] : memref<2x4x128xf32, #tpu.memory_space<vmem>>, vector<1x4x128xf32>
    %182 = vector.shape_cast %181 : vector<1x4x128xf32> to vector<4x128xf32>
    %183 = vector.shape_cast %155 : vector<4x128xf32> to vector<1x4x128xf32>
    tpu.vector_store %arg11[%c0_66, %c0_67, %c0_68], %183 {strides = array<i32>} : memref<2x4x128xf32, #tpu.memory_space<vmem>>, vector<1x4x128xf32>,
    %c1_69 = arith.constant 1 : index
    %c0_70 = arith.constant 0 : index
    %c0_71 = arith.constant 0 : index
    %184 = vector.load %arg9[%c1_69, %c0_70, %c0_71] : memref<2x4x32xf32, #tpu.memory_space<vmem>>, vector<1x4x32xf32>
    %185 = vector.shape_cast %184 : vector<1x4x32xf32> to vector<4x32xf32>
    %186 = vector.shape_cast %172 : vector<4x32xf32> to vector<1x4x32xf32>
    tpu.vector_store %arg9[%c1_69, %c0_70, %c0_71], %186 {strides = array<i32>} : memref<2x4x32xf32, #tpu.memory_space<vmem>>, vector<1x4x32xf32>,
    %c1_72 = arith.constant 1 : index
    %c0_73 = arith.constant 0 : index
    %c0_74 = arith.constant 0 : index
    %187 = vector.load %arg10[%c1_72, %c0_73, %c0_74] : memref<2x4x32xf32, #tpu.memory_space<vmem>>, vector<1x4x32xf32>
    %188 = vector.shape_cast %187 : vector<1x4x32xf32> to vector<4x32xf32>
    %189 = vector.shape_cast %170 : vector<4x32xf32> to vector<1x4x32xf32>
    tpu.vector_store %arg10[%c1_72, %c0_73, %c0_74], %189 {strides = array<i32>} : memref<2x4x32xf32, #tpu.memory_space<vmem>>, vector<1x4x32xf32>,
    %c1_75 = arith.constant 1 : index
    %c0_76 = arith.constant 0 : index
    %c0_77 = arith.constant 0 : index
    %190 = vector.load %arg11[%c1_75, %c0_76, %c0_77] : memref<2x4x128xf32, #tpu.memory_space<vmem>>, vector<1x4x128xf32>
    %191 = vector.shape_cast %190 : vector<1x4x128xf32> to vector<4x128xf32>
    %192 = vector.shape_cast %174 : vector<4x128xf32> to vector<1x4x128xf32>
    tpu.vector_store %arg11[%c1_75, %c0_76, %c0_77], %192 {strides = array<i32>} : memref<2x4x128xf32, #tpu.memory_space<vmem>>, vector<1x4x128xf32>,
    %c1_i32 = arith.constant 1 : i32
    %193 = arith.cmpi eq, %arg1, %c1_i32 : i32
    %194 = arith.extui %193 : i1 to i32
    %c0_i32_78 = arith.constant 0 : i32
    %195 = arith.cmpi ne, %194, %c0_i32_78 : i32
    scf.if %195 {
      %196 = vector.broadcast %13 : vector<1x32xf32> to vector<4x32xf32>
      %197 = arith.mulf %172, %196 : vector<4x32xf32>
      %cst_79 = arith.constant dense<0.000000e+00> : vector<4xf32>
      %198 = vector.multi_reduction <add>, %197, %cst_79 [1] : vector<4x32xf32> to vector<4xf32>
      %199 = vector.shape_cast %198 : vector<4xf32> to vector<4x1xf32>
      %200 = vector.broadcast %14 : vector<1x1xf32> to vector<4x1xf32>
      %201 = arith.addf %199, %200 : vector<4x1xf32>
      %c0_80 = arith.constant 0 : index
      %c0_81 = arith.constant 0 : index
      %c0_82 = arith.constant 0 : index
      %202 = vector.load %arg8[%c0_80, %c0_81, %c0_82] : memref<1x4x1xf32, #tpu.memory_space<vmem>>, vector<1x4x1xf32>
      %203 = vector.shape_cast %202 : vector<1x4x1xf32> to vector<4x1xf32>
      %204 = vector.shape_cast %201 : vector<4x1xf32> to vector<1x4x1xf32>
      tpu.vector_store %arg8[%c0_80, %c0_81, %c0_82], %204 {strides = array<i32>} : memref<1x4x1xf32, #tpu.memory_space<vmem>>, vector<1x4x1xf32>,
    } else {
    }
    return
  }
  func.func @transform_0(%arg0: i32, %arg1: i32) -> (i32, i32, i32, i32) {
    %c0_i32 = arith.constant 0 : i32
    %c0_i32_0 = arith.constant 0 : i32
    %c0_i32_1 = arith.constant 0 : i32
    return %arg0, %arg1, %c0_i32, %c0_i32_0 : i32, i32, i32, i32
  }
  func.func @transform_1(%arg0: i32, %arg1: i32) -> (i32, i32, i32) {
    %c0_i32 = arith.constant 0 : i32
    %c0_i32_0 = arith.constant 0 : i32
    %c0_i32_1 = arith.constant 0 : i32
    %c0_i32_2 = arith.constant 0 : i32
    return %c0_i32, %c0_i32_0, %c0_i32_1 : i32, i32, i32
  }
  func.func @transform_2(%arg0: i32, %arg1: i32) -> (i32, i32, i32) {
    %c0_i32 = arith.constant 0 : i32
    %c0_i32_0 = arith.constant 0 : i32
    %c0_i32_1 = arith.constant 0 : i32
    %c0_i32_2 = arith.constant 0 : i32
    return %c0_i32, %c0_i32_0, %c0_i32_1 : i32, i32, i32
  }
  func.func @transform_3(%arg0: i32, %arg1: i32) -> (i32, i32, i32) {
    %c0_i32 = arith.constant 0 : i32
    %c0_i32_0 = arith.constant 0 : i32
    %c0_i32_1 = arith.constant 0 : i32
    %c0_i32_2 = arith.constant 0 : i32
    return %c0_i32, %c0_i32_0, %c0_i32_1 : i32, i32, i32
  }
  func.func @transform_4(%arg0: i32, %arg1: i32) -> (i32, i32) {
    %c0_i32 = arith.constant 0 : i32
    %c0_i32_0 = arith.constant 0 : i32
    %c0_i32_1 = arith.constant 0 : i32
    return %c0_i32, %c0_i32_0 : i32, i32
  }
  func.func @transform_5(%arg0: i32, %arg1: i32) -> (i32, i32) {
    %c0_i32 = arith.constant 0 : i32
    %c0_i32_0 = arith.constant 0 : i32
    %c0_i32_1 = arith.constant 0 : i32
    return %c0_i32, %c0_i32_0 : i32, i32
  }
  func.func @transform_6(%arg0: i32, %arg1: i32) -> (i32, i32, i32) {
    %c0_i32 = arith.constant 0 : i32
    %c0_i32_0 = arith.constant 0 : i32
    %c0_i32_1 = arith.constant 0 : i32
    return %arg0, %c0_i32, %c0_i32_0 : i32, i32, i32
  }
}

</mosaic_0001>

<bundles_post_ra>
// kernel: tpu_custom_call.1
= control target key start
LH: loop header
LB: loop body
LE: loop exit
PB: predicated region body
PF: predicated region fallthrough
CT: control target
= control target key end

     0   :  { %s2709_s0 = inlined_call_operand.hbm [shape: f32[2,8,4,128], index: 0, kind: input, shape index: {}]   ;;  %s2710_s1 = inlined_call_operand.hbm [shape: f32[2,32,128], index: 1, kind: input, shape index: {}]   ;;  %s2711_s2 = inlined_call_operand.hbm [shape: f32[1,32,128], index: 2, kind: input, shape index: {}]   ;;  %s2712_s3 = inlined_call_operand.vmem [shape: f32[1,1,128], index: 3, kind: input, shape index: {}]   ;;  %s2713_s4 = inlined_call_operand.vmem [shape: f32[1,32], index: 4, kind: input, shape index: {}]   ;;  %s2714_s5 = inlined_call_operand.<no memory space> [shape: f32[1,1], index: 5, kind: input, shape index: {}]   ;;  %s2715_s6 = inlined_call_operand.vmem [shape: f32[2,4,1], index: 6, kind: output, shape index: {}]  }
   0x1   :  { %2721 = sst [smem:[#allocation14_spill]] %s2710_s1  ;;  %v11_v0 = vstv %s2714_s5 }
   0x2   :  { %2722 = sst [smem:[#allocation15_spill]] %s2711_s2  ;;  %12 = vst [vmem:[#allocation5] sm:$0x1] %v11_v0 }
   0x3   :  { %2723 = sst [smem:[#allocation16_spill]] %s2713_s4 }
   0x4   :  { %13 = vsyncpa [#allocation7], 0 }
   0x5   :  { %15 = vsyncpa [#allocation7 + $0x1], 0 }
   0x6   :  { %16 = vsyncpa [#allocation9], 0  ;;  %s2302_s23 = smov 0   ;;  %s2304_s24 = smov 0  }
   0x7   :  { %s2306_s25 = smov 0   ;;  %s2308_s26 = smov 0  }
   0x8   :  { %s2310_s27 = smov 0   ;;  %s2312_s28 = smov 0  }
   0x9   :  { %s2314_s29 = smov 0   ;;  %s2316_s30 = smov 0  }
   0xa LB: > { %s1602_s5 = sadd.s32 4294967295, %s2246_s30   ;;  %p56_p0 = scmp.ne.s32.totalorder %s2222_s24, %s2218_s23  ;;  %s2246_s30 = sphi %s2316_s30, %s22_s30   ;;  %s2242_s29 = sphi %s2314_s29, %s2744_s29   ;;  %s2238_s28 = sphi %s2312_s28, %s2743_s28   ;;  %s2234_s27 = sphi %s2310_s27, %s2742_s27   ;;  %s2230_s26 = sphi %s2308_s26, %s2741_s26   ;;  %s2226_s25 = sphi %s2306_s25, %s2740_s25   ;;  %s2222_s24 = sphi %s2304_s24, %s2739_s24   ;;  %s2218_s23 = sphi %s2302_s23, %s2738_s23  }
   0xb   : > { %p2342_p1 = scmp.eq.s32.totalorder %s1602_s5, 0  ;;  %p1604_p2 = scmp.ge.s32.totalorder %s2246_s30, 1 }
   0xc   : > { %p198_p3 = scmp.lt.s32.totalorder %s2246_s30, 5  ;;  %s2248_s10 = smov [#allocation8]  }
   0xd   : > { %s2724_s7 = scalar_select %p2342_p1, 1, 0 }
   0xe   : > { %p2350_p4 = por %p2342_p1, %p56_p0  ;;  %p2354_p5 = pnand %p1604_p2, %p198_p3 }
   0xf   : > { %s210_s11 = sshll.u32 %s2248_s10, 4  ;;  %s2249_s13 = smov [#allocation10]   ;;  %s211_s11 = int_to_ptr.vmem [resolvable:$true] %s210_s11 }
  0x10   : > { %s2725_s8 = scalar_select %p2350_p4, 1, 0 }
  0x11   : > { %s2726_s9 = scalar_select %p2354_p5, 1, 0 }
  0x12   : > { %p1931_p6 = pneg %p2354_p5  ;;  %s223_s14 = sshll.u32 %s2249_s13, 4  ;;  %s2366_s14 = int_to_ptr.vmem [resolvable:$true] %s223_s14 }
  0x13   : > { %s2728_s1 = sld [smem:[#allocation14_spill]] }
  0x14   : > { %p2362_p7 = pnand %p1931_p6, %p2342_p1 }
  0x16   : > { %p2092_p9 = pneg %p2362_p7 }
  0x19   : > { %s2090_s17 = scalar_lea.hbm %s2728_s1, 1024 }
  0x1a   : > { %p2091_p8 = scmp.ne.s32.totalorder %s2728_s1, %s2090_s17  ;;  %p2097_p12 = scmp.lt.u32.totalorder %s2090_s17, %s2728_s1 }
  0x1c   : > { %p2093_p10 = pnand %p2092_p9, %p2091_p8 }
  0x1e   : > { %p2094_p11 = pneg %p2093_p10 }
  0x20   : > { %p2099_p13 = pnand %p2097_p12, %p2094_p11 }
  0x22   : > { %2102 = shalt.err (!%p2099_p13)
}
  0x23   : > { %s2103_s22 = scalar_lea.vmem %s211_s11, 1024  ;;  %p2111_p6 = scmp.lt.s32.totalorder %s211_s11, %s211_s11 }
  0x24   : > { %p2104_p0 = scmp.ne.s32.totalorder %s211_s11, %s2103_s22  ;;  %p2112_p1 = scmp.lt.s32.totalorder %s2103_s22, %s2103_s22 }
  0x26   : > { %p2106_p2 = pnand %p2104_p0, %p2092_p9  ;;  %p2113_p4 = por %p2112_p1, %p2111_p6 }
  0x28   : > { %p2107_p3 = pneg %p2106_p2 }
  0x2a   : > { %p2114_p5 = pnand %p2113_p4, %p2107_p3 }
  0x2c   : > { %2117 = shalt.err (!%p2114_p5)
}
  0x2d   : > { %s2250_s23 = smov 128   ;;  %s2251_s5 = smov 8  }
  0x2e   : > { %1934 = dma.hbm_to_vmem [thread:$0]  (!%p2362_p7), %s2728_s1, 1024, %s211_s11, [#allocation9], %s2250_s23, %s2250_s23, %s2251_s5  }
  0x2f   : > { %s2729_s2 = sld [smem:[#allocation15_spill]] }
  0x35   : > { %s2118_s17 = scalar_lea.hbm %s2729_s2, 512 }
  0x36   : > { %p2119_p8 = scmp.ne.s32.totalorder %s2729_s2, %s2118_s17  ;;  %p2125_p5 = scmp.lt.u32.totalorder %s2118_s17, %s2729_s2 }
  0x38   : > { %p2121_p1 = pnand %p2119_p8, %p2092_p9 }
  0x3a   : > { %p2122_p4 = pneg %p2121_p1 }
  0x3c   : > { %p2127_p10 = pnand %p2125_p5, %p2122_p4 }
  0x3e   : > { %2130 = shalt.err (!%p2127_p10)
}
  0x3f   : > { %s2131_s11 = scalar_lea.vmem %s2366_s14, 512  ;;  %p2139_p0 = scmp.lt.s32.totalorder %s2366_s14, %s2366_s14 }
  0x40   : > { %p2132_p11 = scmp.ne.s32.totalorder %s2366_s14, %s2131_s11  ;;  %p2140_p2 = scmp.lt.s32.totalorder %s2131_s11, %s2131_s11 }
  0x42   : > { %p2134_p12 = pnand %p2132_p11, %p2092_p9  ;;  %p2141_p3 = por %p2140_p2, %p2139_p0 }
  0x44   : > { %p2135_p13 = pneg %p2134_p12 }
  0x46   : > { %p2142_p6 = pnand %p2141_p3, %p2135_p13 }
  0x48   : > { %2145 = shalt.err (!%p2142_p6)
}
  0x49   : > { %1937 = dma.hbm_to_vmem [thread:$0]  (!%p2362_p7), %s2729_s2, 512, %s2366_s14, [#allocation9], %s2250_s23, %s2250_s23, %s2251_s5  }
  0x4a   : > { %s31_s13 = sadd.s32 1, %s2238_s28  ;;  %s34_s15 = sadd.s32 1, %s2242_s29 }
  0x4b   : > { %p32_p9 = scmp.ge.s32.totalorder %s31_s13, 2  ;;  %s43_s12 = sadd.s32 1, %s2226_s25 }
  0x4c   : > { %p50_p8 = scmp.ne.s32.totalorder %s2226_s25, %s2222_s24  ;;  %p51_p1 = scmp.eq.s32.totalorder %s2246_s30, 0 }
  0x4d   : > { %s2746_s13 = smov (%p32_p9, %s31_s13), 0  ;;  %s2748_s15 = smov (!%p32_p9, %s34_s15), %s2242_s29 }
  0x4e   : > { %2730 = sst [smem:[#allocation13_spill]] %s2746_s13  ;;  %s39_s16 = ssub.s32 %s2238_s28, %s2746_s13 }
  0x4f   : > { %p2426_p4 = por %p51_p1, %p50_p8  ;;  %p36_p5 = scmp.ge.s32.totalorder %s2748_s15, 2 }
  0x50   : > { %p1944_p7 = scmp.lt.s32.totalorder %s2246_s30, 4  ;;  %s246_s14 = sand.u32 1, %s2226_s25  }
  0x51   : > { %s1609_s23 = sshll.u32 %s2238_s28, 2  ;;  %s2750_s15 = smov (%p36_p5, %s2748_s15), 0 }
  0x52   : > { %s1608_s5 = sshll.u32 %s246_s14, 4  ;;  %s38_s18 = ssub.s32 %s2242_s29, %s2750_s15 }
  0x53   : > { %s40_s19 = sor.u32 %s39_s16, %s38_s18  ;;  %s1610_s20 = sshll.u32 %s2242_s29, 3 }
  0x54   : > { %p41_p10 = scmp.eq.s32.totalorder %s40_s19, 0  ;;  %s256_s21 = sadd.s32 %s1610_s20, %s1609_s23 }
  0x55   : > { %s1611_s11 = sshll.u32 %s256_s21, 6  ;;  %s250_s22 = scalar_lea.vmem [#allocation6], %s1608_s5 }
  0x56   : > { %s259_s10 = sshll.u32 %s250_s22, 4  ;;  %s2444_s4 = scalar_lea.hbm %s2709_s0, %s1611_s11  ;;  %s2446_s10 = int_to_ptr.vmem [resolvable:$true] %s259_s10 }
  0x57   : > { %s2439_s1 = scalar_select %p41_p10, %s2226_s25, %s43_s12  }
  0x58   : > { %p2452_p11 = pnand %p1944_p7, %p2426_p4  ;;  %s2456_s12 = scalar_lea.sflag [#allocation7], %s246_s14 }
  0x59   : > { %s2146_s23 = scalar_lea.hbm %s2444_s4, 256  ;;  %s2151_s17 = scalar_lea.hbm %s2709_s0, 1024 }
  0x5a   : > { %p2147_p12 = scmp.ne.s32.totalorder %s2444_s4, %s2146_s23  ;;  %p2148_p13 = pneg %p2452_p11 }
  0x5b   : > { %p2152_p3 = scmp.lt.u32.totalorder %s2444_s4, %s2709_s0  ;;  %p2153_p6 = scmp.lt.u32.totalorder %s2151_s17, %s2146_s23 }
  0x5c   : > { %p2149_p0 = pnand %p2148_p13, %p2147_p12  ;;  %p2155_p8 = scmp.lt.u32.totalorder %s2146_s23, %s2444_s4 }
  0x5d   : > { %p2154_p9 = por %p2153_p6, %p2152_p3 }
  0x5e   : > { %p2150_p2 = pneg %p2149_p0 }
  0x5f   : > { %p2156_p1 = por %p2155_p8, %p2154_p9 }
  0x61   : > { %p2157_p4 = pnand %p2156_p1, %p2150_p2 }
  0x63   : > { %2160 = shalt.err (!%p2157_p4)
}
  0x64   : > { %s2161_s14 = scalar_lea.vmem %s2446_s10, 256  ;;  %s2252_s19 = smov [#allocation6]  }
  0x65   : > { %p2162_p5 = scmp.ne.s32.totalorder %s2446_s10, %s2161_s14  ;;  %s2166_s20 = sshll.u32 %s2252_s19, 4  ;;  %s2167_s20 = int_to_ptr.vmem [resolvable:$false] %s2166_s20 }
  0x66   : > { %s2168_s21 = scalar_lea.vmem %s2167_s20, 512  ;;  %p2169_p12 = scmp.lt.s32.totalorder %s2446_s10, %s2167_s20 }
  0x67   : > { %p2164_p7 = pnand %p2162_p5, %p2148_p13  ;;  %p2170_p0 = scmp.lt.s32.totalorder %s2168_s21, %s2161_s14 }
  0x69   : > { %p2165_p10 = pneg %p2164_p7  ;;  %p2171_p3 = por %p2170_p0, %p2169_p12 }
  0x6b   : > { %p2172_p6 = pnand %p2171_p3, %p2165_p10 }
  0x6d   : > { %2175 = shalt.err (!%p2172_p6)
}
  0x6e   : > { %s2253_s11 = smov 64   ;;  %s2254_s22 = smov 4  }
  0x6f   : > { %1941 = dma.hbm_to_vmem [thread:$0]  (!%p2452_p11), %s2444_s4, 256, %s2446_s10, %s2456_s12, %s2253_s11, %s2253_s11, %s2254_s22  }
  0x70   : > { %p2733_p13 = scmp.ne.s32.totalorder %s2726_s9, 0 }
  0x71   : > { %s273_s23 = sand.u32 (!%p2733_p13), 1, %s2222_s24   ;;  %p2734_p2 = scmp.ne.s32.totalorder (!%p2733_p13), %s2725_s8, 0 }
  0x72   : > { %271 = sbr.rel (%p2733_p13) target bundleno = 3675 (0xe5b), region = 44  ;;  %s1613_s2 = sshll.u32 (!%p2733_p13), %s273_s23, 4 }
  0x73   : > { %s274_s13 = scalar_lea.sflag (!%p2733_p13), [#allocation7], %s273_s23  ;;  %s2487_s17 = scalar_lea.vmem (!%p2733_p13), [#allocation6], %s1613_s2 }
  0x79   : > { %2209 = dma.done.wait (%p2734_p2), %s274_s13, 256  }
  0x7a   : > { %2211 = vsyncadd (%p2734_p2), %s274_s13, 4294967040  ;;  %p2735_p9 = scmp.ne.s32.totalorder %s2724_s7, 0 }
  0x7c   : > { %2213 = dma.done.wait (%p2735_p9), [#allocation9], 1536  }
  0x7d   : > { %2215 = vsyncadd (%p2735_p9), [#allocation9], 4294965760  ;;  %p314_p11 = scmp.lt.s32.totalorder %s2234_s27, 1  ;;  %p1617_p8 = scmp.ne.s32.totalorder %s2230_s26, 0 }
  0x7e   : > { %vm322_vm0 = vcmask (!%p1617_p8), 257024   ;;  %v1618_v1 = vld [vmem:[%s2712_s3] ss:$0 sm:$0xff] (!%p1617_p8)  ;;  %v2255_v2 = vmov (!%p1617_p8), 0.0  }
  0x7f   : > { %s2752_s27 = smov (!%p314_p11, %s2234_s27), 1  ;;  %321 = sbr.rel (%p1617_p8) target bundleno = 134 (0x86), region = 60 }
  0x80   : > { %s1616_s4 = sshll.u32 %s2752_s27, 2  ;;  %325 = vst.msk [vmem:[#allocation3] sm:$0xf] (!%p1617_p8), %vm322_vm0, %v2255_v2  ;;  %326 = vst.msk [vmem:[#allocation3 + $0x4] sm:$0xf] (!%p1617_p8), %vm322_vm0, %v2255_v2 }
  0x81   : > { %s2502_s16 = scalar_lea.vmem %s2715_s6, %s1616_s4  ;;  %327 = vst [vmem:[#allocation4] sm:$0xf] (!%p1617_p8), %v2255_v2  ;;  %336 = vst [vmem:[#allocation4 + $0x4] sm:$0xf] (!%p1617_p8), %v1618_v1 }
  0x86 PF: > { %v365_v4 = vld [vmem:[%s2487_s17] sm:$0xf]  ;;  %s2256_s27 = smov 64   ;;  %s2257_s7 = smov 32   ;;  %v2520_v19 = vld [vmem:[#allocation5] ss:$0 sm:$0xff] }
  0x87   : > { %v359_v7 = vld [vmem:[#allocation3] sm:$0xf]  ;;  %s2736_s14 = sld [smem:[#allocation16_spill]]  ;;  %v337_v20 = vld [vmem:[#allocation8] sm:$0xff]  ;;  %v2258_v21 = vmov 0.0|0.0   ;;  %v340_v28 = vld [vmem:[#allocation8 + $0x18] sm:$0xff] }
  0x88   : > { %v362_v3 = vld [vmem:[#allocation4] sm:$0xf]  ;;  %1840 = vmatprep.subr.bf16.mxu0 %v2258_v21  ;;  %1846 = vmatprep.subr.bf16.mxu1 %v2258_v21  ;;  %v338_v22 = vld [vmem:[#allocation8 + $0x8] sm:$0xff]  ;;  %v346_v23 = vld [vmem:[#allocation10] sm:$0xff]  ;;  %vm2259_vm1 = vmmov 0   ;;  %v2260_v30 = vmov 0.0  }
  0x89   : > { %v366_v5 = vadd.f32 %v365_v4, %v362_v3  ;;  %v347_v24 = vld [vmem:[#allocation10 + $0x8] sm:$0xff]  ;;  %v2524_v25 = vpack.c.bf16 %v338_v22, %v337_v20  ;;  %v339_v27 = vld [vmem:[#allocation8 + $0x10] sm:$0xff]  ;;  %1716 = vmatprep.mubr.msk.f32.mxu0 %vm2259_vm1, %v2260_v30  ;;  %1727 = vmatprep.mubr.msk.f32.mxu1 %vm2259_vm1, %v2260_v30  ;;  %v349_v31 = vld [vmem:[#allocation10 + $0x18] sm:$0xff]  ;;  %vm398_vm2 = vcmask 261120   ;;  %vm1458_vm3 = vcmask 257024   ;;  %s2261_s21 = smov 96  }
  0x8a   : > { %v2526_v26 = vpack.c.bf16 %v347_v24, %v346_v23  ;;  %v348_v29 = vld [vmem:[#allocation10 + $0x10] sm:$0xff]  ;;  %v2534_v32 = vpack.c.bf16 %v340_v28, %v339_v27  ;;  %v364_v39 = vld [vmem:[#allocation4 + $0x4] sm:$0xf]  ;;  %v342_v4 = vld [vmem:[#allocation8 + $0x20] sm:$0xff]  ;;  %p1643_p1 = scmp.ne.s32.totalorder %s2230_s26, 1 }
  0x8b   : > { %2026 = vtanh.f32 %v366_v5  ;;  %v1620_v8 = vmul.f32 -1.442695, %v366_v5  ;;  %1842 = vmatpush3.bf16.msra.mxu0 %v2524_v25  ;;  %v2536_v33 = vpack.c.bf16 %v349_v31, %v348_v29  ;;  %v1625_v38 = vld [vmem:[%s2487_s17 + $0x4] sm:$0xf]  ;;  %v343_v5 = vld [vmem:[#allocation8 + $0x28] sm:$0xff]  ;;  %s2262_s11 = smov (!%p1643_p1), 96  }
  0x8c   : > { %1848 = vmatpush3.bf16.msra.mxu1 %v2526_v26  ;;  %1843 = vmatprep.subr.bf16.mxu0 %v2258_v21  ;;  %v361_v48 = vld [vmem:[#allocation3 + $0x4] sm:$0xf]  ;;  %v1631_v20 = vld [vmem:[%s2487_s17 + $0x8] sm:$0xf]  ;;  %v2606_v27 = vld [vmem:[%s2712_s3] ss:$0 sm:$0xff] }
  0x8d   : > { %2028 = vpow2.f32 %v1620_v8  ;;  %v2518_v18 = vld [vmem:[%s2736_s14] ss:$0 sm:$0xff]  ;;  %1849 = vmatprep.subr.bf16.mxu1 %v2258_v21  ;;  %v345_v8 = vld [vmem:[#allocation8 + $0x38] sm:$0xff]  ;;  %s2263_s22 = smov (!%p1643_p1), 32   ;;  %vm1502_vm4 = vcmask (!%p1643_p1), 3072  }
  0x8f   : > { %1845 = vmatpush3.bf16.msra.mxu0 %v2534_v32 }
  0x90   : > { %1851 = vmatpush3.bf16.msra.mxu1 %v2536_v33  ;;  %1852 = vmatprep.subr.bf16.mxu0 %v2258_v21 }
  0x91   : > { %1858 = vmatprep.subr.bf16.mxu1 %v2258_v21 }
  0x95   : > { %v2027_v6 = vpop.eup %2026 }
  0x96   : > { %380 = vrot.lane.b32.xlu0 %v2027_v6, %s2256_s27  ;;  %v344_v6 = vld [vmem:[#allocation8 + $0x30] sm:$0xff] }
  0x97   : > { %v2029_v9 = vpop.eup %2028 }
  0x98   : > { %v370_v10 = vadd.f32 1.0, %v2029_v9  ;;  %v2572_v9 = vpack.c.bf16 %v345_v8, %v344_v6 }
  0x9a   : > { %375 = vrot.lane.b32.xlu0 %v359_v7, %s2257_s7  ;;  %2030 = vrcp.f32 %v370_v10  ;;  %v2569_v7 = vpack.c.bf16 %v343_v5, %v342_v4 }
  0xa4   : > { %v2031_v11 = vpop.eup %2030 }
 0x108   : > { %v381_v12 = vpop.permute.xlu0 %380 }
 0x109   : > { %v383_v13 = vmul.f32 %v2031_v11, %v381_v12 }
 0x10b   : > { %385 = vrot.lane.b32.xlu1 %v383_v13, %s2257_s7 }
 0x10c   : > { %v376_v14 = vpop.permute.xlu0 %375 }
 0x10d   : > { %v378_v15 = vmul.f32 %v2031_v11, %v376_v14 }
 0x17d   : > { %v386_v16 = vpop.permute.xlu1 %385 }
 0x17e   : > { %v2512_v17 = vadd.f32 %v386_v16, %v378_v15 }
 0x180   : > { %2032 = vtanh.f32 %v2512_v17 }
 0x18a   : > { %v2033_v34 = vpop.eup %2032 }
 0x18b   : > { %391 = vrot.lane.b32.xlu1 %v2033_v34, %s2256_s27 }
 0x1fd   : > { %v392_v35 = vpop.permute.xlu1 %391 }
 0x1fe   : > { %v394_v36 = vmul.f32 %v2031_v11, %v392_v35 }
 0x200   : > { %396 = vrot.lane.b32.xlu0 %v394_v36, %s2257_s7 }
 0x272   : > { %v397_v37 = vpop.permute.xlu0 %396 }
 0x273   : > { %1717 = vmatmul.mubr.msk.f32.vlgmr.msra.gmra.mrb[0].mxu0 %vm398_vm2, %v397_v37  ;;  %1728 = vmatmul.mubr.msk.f32.vlgmr.msra.gmra.mrb[0].mxu1 %vm398_vm2, %v397_v37 }
 0x274   : > { %1860 = vmatpush3.bf16.msra.mxu1 %v2524_v25  ;;  %1738 = vmatprep.mubr.msk.f32.mxu0 %vm2259_vm1, %v2260_v30 }
 0x275   : > { %1861 = vmatprep.subr.bf16.mxu1 %v2258_v21  ;;  %1749 = vmatprep.mubr.msk.f32.mxu1 %vm2259_vm1, %v2260_v30 }
 0x276   : > { %1854 = vmatpush3.bf16.msra.mxu0 %v2569_v7 }
 0x277   : > { %1855 = vmatprep.subr.bf16.mxu0 %v2258_v21 }
 0x278   : > { %1863 = vmatpush3.bf16.msra.mxu1 %v2534_v32 }
 0x279   : > { %1870 = vmatprep.subr.bf16.mxu1 %v2258_v21 }
 0x27a   : > { %1857 = vmatpush3.bf16.msra.mxu0 %v2572_v9 }
 0x27b   : > { %1864 = vmatprep.subr.bf16.mxu0 %v2258_v21 }
 0x346   : > { %v467_v40 = vpop.f32.mrb[0].mxu0  ;;  %v537_v41 = vpop.f32.mrb[0].mxu1 }
 0x347   : > { %v646_v42 = vadd.f32 %v1625_v38, %v467_v40  ;;  %v538_v43 = vadd.f32 %v537_v41, %v364_v39  ;;  %v1718_v44 = vpop.f32.mrb[1].mxu0  ;;  %v1729_v45 = vpop.f32.mrb[1].mxu1 }
 0x349   : > { %2034 = vtanh.f32 %v646_v42  ;;  %v1626_v49 = vmul.f32 -1.442695, %v646_v42  ;;  %v1623_v50 = vmul.f32 -1.442695, %v538_v43 }
 0x34a   : > { %2036 = vtanh.f32 %v538_v43 }
 0x34b   : > { %2038 = vpow2.f32 %v1626_v49 }
 0x34c   : > { %2040 = vpow2.f32 %v1623_v50 }
 0x353   : > { %v2035_v46 = vpop.eup %2034 }
 0x354   : > { %v2037_v47 = vpop.eup %2036  ;;  %656 = vrot.lane.b32.xlu0 %v2035_v46, %s2256_s27 }
 0x355   : > { %554 = vrot.lane.b32.xlu1 %v2037_v47, %s2256_s27  ;;  %v2039_v51 = vpop.eup %2038 }
 0x356   : > { %v2041_v52 = vpop.eup %2040  ;;  %v650_v53 = vadd.f32 1.0, %v2039_v51 }
 0x357   : > { %v544_v54 = vadd.f32 1.0, %v2041_v52 }
 0x358   : > { %2042 = vrcp.f32 %v650_v53 }
 0x359   : > { %549 = vrot.lane.b32.xlu1 %v361_v48, %s2257_s7  ;;  %2044 = vrcp.f32 %v544_v54 }
 0x362   : > { %v2043_v55 = vpop.eup %2042 }
 0x363   : > { %v2045_v57 = vpop.eup %2044  ;;  %v654_v62 = vmul.f32 %v2043_v55, %v2512_v17 }
 0x3c6   : > { %v657_v56 = vpop.permute.xlu0 %656 }
 0x3c7   : > { %v555_v58 = vpop.permute.xlu1 %554  ;;  %v659_v59 = vmul.f32 %v2043_v55, %v657_v56 }
 0x3c8   : > { %v557_v60 = vmul.f32 %v2045_v57, %v555_v58 }
 0x3c9   : > { %661 = vrot.lane.b32.xlu1 %v659_v59, %s2257_s7 }
 0x3ca   : > { %559 = vrot.lane.b32.xlu0 %v557_v60, %s2257_s7 }
 0x3cb   : > { %v550_v61 = vpop.permute.xlu1 %549 }
 0x3cc   : > { %v552_v63 = vmul.f32 %v2045_v57, %v550_v61 }
 0x43b   : > { %v662_v0 = vpop.permute.xlu1 %661 }
 0x43c   : > { %v560_v1 = vpop.permute.xlu0 %559  ;;  %v2563_v2 = vadd.f32 %v662_v0, %v654_v62  ;;  %v1637_v62 = vld [vmem:[%s2487_s17 + $0xc] sm:$0xf] }
 0x43d   : > { %v2565_v3 = vadd.f32 %v560_v1, %v552_v63 }
 0x43e   : > { %2046 = vtanh.f32 %v2563_v2 }
 0x43f   : > { %2048 = vtanh.f32 %v2565_v3 }
 0x448   : > { %v2047_v10 = vpop.eup %2046 }
 0x449   : > { %v2049_v11 = vpop.eup %2048  ;;  %667 = vrot.lane.b32.xlu1 %v2047_v10, %s2256_s27 }
 0x44a   : > { %565 = vrot.lane.b32.xlu0 %v2049_v11, %s2256_s27 }
 0x4bb   : > { %v668_v12 = vpop.permute.xlu1 %667 }
 0x4bc   : > { %v566_v13 = vpop.permute.xlu0 %565  ;;  %v670_v14 = vmul.f32 %v2043_v55, %v668_v12 }
 0x4bd   : > { %v568_v15 = vmul.f32 %v2045_v57, %v566_v13 }
 0x4be   : > { %672 = vrot.lane.b32.xlu1 %v670_v14, %s2257_s7 }
 0x4bf   : > { %570 = vrot.lane.b32.xlu0 %v568_v15, %s2257_s7 }
 0x530   : > { %v673_v16 = vpop.permute.xlu1 %672 }
 0x531   : > { %v571_v17 = vpop.permute.xlu0 %570  ;;  %1750 = vmatmul.mubr.msk.f32.vlgmr.msra.gmra.mrb[2].mxu1 %vm398_vm2, %v673_v16 }
 0x532   : > { %1739 = vmatmul.mubr.msk.f32.vlgmr.msra.gmra.mrb[2].mxu0 %vm398_vm2, %v571_v17  ;;  %1872 = vmatpush3.bf16.msra.mxu1 %v2569_v7 }
 0x533   : > { %1866 = vmatpush3.bf16.msra.mxu0 %v2526_v26  ;;  %1760 = vmatprep.mubr.msk.f32.mxu0 %vm2259_vm1, %v2260_v30 }
 0x534   : > { %1867 = vmatprep.subr.bf16.mxu0 %v2258_v21  ;;  %1873 = vmatprep.subr.bf16.mxu1 %v2258_v21 }
 0x535   : > { %1771 = vmatprep.mubr.msk.f32.mxu1 %vm2259_vm1, %v2260_v30 }
 0x536   : > { %1875 = vmatpush3.bf16.msra.mxu1 %v2572_v9 }
 0x537   : > { %1869 = vmatpush3.bf16.msra.mxu0 %v2536_v33  ;;  %1882 = vmatprep.subr.bf16.mxu1 %v2258_v21 }
 0x538   : > { %1876 = vmatprep.subr.bf16.mxu0 %v2258_v21 }
 0x53a   : > { %1761 = vmatmul.mubr.msk.f32.vlgmr.msra.gmra.mrb[2].mxu0 %vm398_vm2, %v673_v16 }
 0x53b   : > { %1878 = vmatpush3.bf16.msra.mxu0 %v2524_v25  ;;  %1782 = vmatprep.mubr.msk.f32.mxu0 %vm2259_vm1, %v2260_v30 }
 0x53c   : > { %1879 = vmatprep.subr.bf16.mxu0 %v2258_v21 }
 0x53f   : > { %1881 = vmatpush3.bf16.msra.mxu0 %v2534_v32 }
 0x540   : > { %1888 = vmatprep.subr.bf16.mxu0 %v2258_v21 }
 0x604   : > { %v742_v22 = vpop.f32.mrb[2].mxu1 }
 0x605   : > { %v917_v23 = vadd.f32 %v1631_v20, %v742_v22  ;;  %v1751_v24 = vpop.f32.mrb[3].mxu1 }
 0x607   : > { %2050 = vtanh.f32 %v917_v23  ;;  %v1632_v36 = vmul.f32 -1.442695, %v917_v23 }
 0x60d   : > { %v812_v28 = vpop.f32.mrb[2].mxu0 }
 0x60e   : > { %v1912_v29 = vadd.f32 %v2606_v27, %v812_v28  ;;  %v1762_v31 = vpop.f32.mrb[3].mxu0 }
 0x610   : > { %2052 = vtanh.f32 %v1912_v29  ;;  %v1629_v37 = vmul.f32 -1.442695, %v1912_v29 }
 0x611   : > { %v2051_v34 = vpop.eup %2050  ;;  %2054 = vpow2.f32 %v1632_v36 }
 0x612   : > { %927 = vrot.lane.b32.xlu1 %v2051_v34, %s2256_s27  ;;  %2056 = vpow2.f32 %v1629_v37 }
 0x61a   : > { %v2053_v35 = vpop.eup %2052 }
 0x61b   : > { %825 = vrot.lane.b32.xlu0 %v2053_v35, %s2256_s27  ;;  %v2055_v38 = vpop.eup %2054 }
 0x61c   : > { %v921_v39 = vadd.f32 1.0, %v2055_v38  ;;  %v2057_v40 = vpop.eup %2056 }
 0x61d   : > { %v819_v41 = vadd.f32 1.0, %v2057_v40 }
 0x61e   : > { %2058 = vrcp.f32 %v921_v39 }
 0x61f   : > { %2060 = vrcp.f32 %v819_v41 }
 0x628   : > { %v2059_v42 = vpop.eup %2058 }
 0x629   : > { %v2061_v45 = vpop.eup %2060  ;;  %v925_v48 = vmul.f32 %v2059_v42, %v2563_v2 }
 0x62a   : > { %v823_v51 = vmul.f32 %v2061_v45, %v2565_v3 }
 0x684   : > { %v928_v43 = vpop.permute.xlu1 %927 }
 0x685   : > { %v930_v44 = vmul.f32 %v2059_v42, %v928_v43 }
 0x687   : > { %932 = vrot.lane.b32.xlu1 %v930_v44, %s2257_s7 }
 0x68d   : > { %v826_v46 = vpop.permute.xlu0 %825 }
 0x68e   : > { %v828_v47 = vmul.f32 %v2061_v45, %v826_v46 }
 0x690   : > { %830 = vrot.lane.b32.xlu0 %v828_v47, %s2257_s7 }
 0x6f9   : > { %v933_v49 = vpop.permute.xlu1 %932 }
 0x6fa   : > { %v2614_v50 = vadd.f32 %v933_v49, %v925_v48 }
 0x6fc   : > { %2062 = vtanh.f32 %v2614_v50 }
 0x702   : > { %v831_v52 = vpop.permute.xlu0 %830 }
 0x703   : > { %v2618_v53 = vadd.f32 %v831_v52, %v823_v51 }
 0x705   : > { %2064 = vtanh.f32 %v2618_v53 }
 0x706   : > { %v2063_v54 = vpop.eup %2062 }
 0x707   : > { %938 = vrot.lane.b32.xlu1 %v2063_v54, %s2256_s27 }
 0x70f   : > { %v2065_v55 = vpop.eup %2064 }
 0x710   : > { %836 = vrot.lane.b32.xlu0 %v2065_v55, %s2256_s27 }
 0x779   : > { %v939_v56 = vpop.permute.xlu1 %938 }
 0x77a   : > { %v941_v57 = vmul.f32 %v2059_v42, %v939_v56 }
 0x77c   : > { %943 = vrot.lane.b32.xlu1 %v941_v57, %s2257_s7 }
 0x782   : > { %v837_v58 = vpop.permute.xlu0 %836 }
 0x783   : > { %v839_v59 = vmul.f32 %v2061_v45, %v837_v58 }
 0x785   : > { %841 = vrot.lane.b32.xlu0 %v839_v59, %s2257_s7 }
 0x7ee   : > { %v944_v60 = vpop.permute.xlu1 %943 }
 0x7ef   : > { %1783 = vmatmul.mubr.msk.f32.vlgmr.msra.gmra.mrb[4].mxu0 %vm398_vm2, %v944_v60 }
 0x7f0   : > { %1890 = vmatpush3.bf16.msra.mxu0 %v2569_v7  ;;  %1804 = vmatprep.mubr.msk.f32.mxu0 %vm2259_vm1, %v2260_v30 }
 0x7f1   : > { %1891 = vmatprep.subr.bf16.mxu0 %v2258_v21 }
 0x7f4   : > { %1893 = vmatpush3.bf16.msra.mxu0 %v2572_v9 }
 0x7f5   : > { %1900 = vmatprep.subr.bf16.mxu0 %v2258_v21 }
 0x7f7   : > { %v842_v61 = vpop.permute.xlu0 %841 }
 0x7f8   : > { %1772 = vmatmul.mubr.msk.f32.vlgmr.msra.gmra.mrb[4].mxu1 %vm398_vm2, %v842_v61 }
 0x7f9   : > { %1884 = vmatpush3.bf16.msra.mxu1 %v2526_v26  ;;  %1793 = vmatprep.mubr.msk.f32.mxu1 %vm2259_vm1, %v2260_v30 }
 0x7fa   : > { %1885 = vmatprep.subr.bf16.mxu1 %v2258_v21 }
 0x7fd   : > { %1887 = vmatpush3.bf16.msra.mxu1 %v2536_v33 }
 0x7fe   : > { %1894 = vmatprep.subr.bf16.mxu1 %v2258_v21 }
 0x800   : > { %1794 = vmatmul.mubr.msk.f32.vlgmr.msra.gmra.mrb[4].mxu1 %vm398_vm2, %v944_v60 }
 0x801   : > { %1896 = vmatpush3.bf16.msra.mxu1 %v2524_v25  ;;  %1815 = vmatprep.mubr.msk.f32.mxu1 %vm2259_vm1, %v2260_v30 }
 0x802   : > { %1897 = vmatprep.subr.bf16.mxu1 %v2258_v21 }
 0x805   : > { %1899 = vmatpush3.bf16.msra.mxu1 %v2534_v32 }
 0x806   : > { %1906 = vmatprep.subr.bf16.mxu1 %v2258_v21 }
 0x8c2   : > { %v1013_v63 = vpop.f32.mrb[4].mxu0 }
 0x8c3   : > { %v1188_v0 = vadd.f32 %v1637_v62, %v1013_v63  ;;  %v1784_v1 = vpop.f32.mrb[5].mxu0 }
 0x8c5   : > { %2066 = vtanh.f32 %v1188_v0  ;;  %v1638_v6 = vmul.f32 -1.442695, %v1188_v0 }
 0x8cf   : > { %v2067_v2 = vpop.eup %2066 }
 0x8d0   : > { %1198 = vrot.lane.b32.xlu1 %v2067_v2, %s2256_s27 }
 0x8d3   : > { %v1083_v3 = vpop.f32.mrb[4].mxu1 }
 0x8d4   : > { %v1913_v25 = vadd.f32 %v2606_v27, %v1083_v3  ;;  %v1795_v4 = vpop.f32.mrb[5].mxu1 }
 0x8d6   : > { %2068 = vtanh.f32 %v1913_v25  ;;  %v1635_v10 = vmul.f32 -1.442695, %v1913_v25 }
 0x8d7   : > { %2070 = vpow2.f32 %v1638_v6 }
 0x8e0   : > { %v2069_v5 = vpop.eup %2068 }
 0x8e1   : > { %1096 = vrot.lane.b32.xlu0 %v2069_v5, %s2256_s27  ;;  %v2071_v32 = vpop.eup %2070 }
 0x8e2   : > { %v1192_v8 = vadd.f32 1.0, %v2071_v32 }
 0x8e4   : > { %2072 = vrcp.f32 %v1192_v8 }
 0x8e5   : > { %2074 = vpow2.f32 %v1635_v10 }
 0x8ee   : > { %v2073_v11 = vpop.eup %2072 }
 0x8ef   : > { %v2075_v12 = vpop.eup %2074  ;;  %v1196_v22 = vmul.f32 %v2073_v11, %v2614_v50 }
 0x8f0   : > { %v1090_v15 = vadd.f32 1.0, %v2075_v12 }
 0x8f2   : > { %2076 = vrcp.f32 %v1090_v15 }
 0x8fc   : > { %v2077_v16 = vpop.eup %2076 }
 0x8fd   : > { %v1094_v29 = vmul.f32 %v2077_v16, %v2618_v53 }
 0x942   : > { %v1199_v13 = vpop.permute.xlu1 %1198 }
 0x943   : > { %v1201_v14 = vmul.f32 %v2073_v11, %v1199_v13 }
 0x945   : > { %1203 = vrot.lane.b32.xlu1 %v1201_v14, %s2257_s7 }
 0x953   : > { %v1097_v17 = vpop.permute.xlu0 %1096 }
 0x954   : > { %v1099_v20 = vmul.f32 %v2077_v16, %v1097_v17 }
 0x956   : > { %1101 = vrot.lane.b32.xlu0 %v1099_v20, %s2257_s7 }
 0x9b7   : > { %v1204_v23 = vpop.permute.xlu1 %1203 }
 0x9b8   : > { %v1206_v24 = vadd.f32 %v1204_v23, %v1196_v22 }
 0x9ba   : > { %2078 = vtanh.f32 %v1206_v24 }
 0x9c4   : > { %v2079_v28 = vpop.eup %2078 }
 0x9c5   : > { %1209 = vrot.lane.b32.xlu1 %v2079_v28, %s2256_s27 }
 0x9c8   : > { %v1102_v31 = vpop.permute.xlu0 %1101 }
 0x9c9   : > { %v1104_v34 = vadd.f32 %v1102_v31, %v1094_v29 }
 0x9cb   : > { %2080 = vtanh.f32 %v1104_v34 }
 0x9d5   : > { %v2081_v35 = vpop.eup %2080 }
 0x9d6   : > { %1107 = vrot.lane.b32.xlu0 %v2081_v35, %s2256_s27 }
 0xa37   : > { %v1210_v36 = vpop.permute.xlu1 %1209 }
 0xa38   : > { %v1212_v37 = vmul.f32 %v2073_v11, %v1210_v36 }
 0xa3a   : > { %1214 = vrot.lane.b32.xlu1 %v1212_v37, %s2257_s7 }
 0xa48   : > { %v1108_v38 = vpop.permute.xlu0 %1107 }
 0xa49   : > { %v1110_v39 = vmul.f32 %v2077_v16, %v1108_v38 }
 0xa4b   : > { %1112 = vrot.lane.b32.xlu0 %v1110_v39, %s2257_s7 }
 0xaac   : > { %v1215_v40 = vpop.permute.xlu1 %1214 }
 0xaad   : > { %1816 = vmatmul.mubr.msk.f32.vlgmr.msra.gmra.mrb[6].mxu1 %vm398_vm2, %v1215_v40 }
 0xaae   : > { %1908 = vmatpush3.bf16.msra.mxu1 %v2569_v7  ;;  %1837 = vmatprep.mubr.msk.f32.mxu1 %vm2259_vm1, %v2260_v30 }
 0xaaf   : > { %1909 = vmatprep.subr.bf16.mxu1 %v2258_v21 }
 0xab2   : > { %1911 = vmatpush3.bf16.msra.mxu1 %v2572_v9 }
 0xabd   : > { %v1113_v41 = vpop.permute.xlu0 %1112 }
 0xabe   : > { %1805 = vmatmul.mubr.msk.f32.vlgmr.msra.gmra.mrb[6].mxu0 %vm398_vm2, %v1113_v41 }
 0xabf   : > { %1902 = vmatpush3.bf16.msra.mxu0 %v2526_v26  ;;  %1826 = vmatprep.mubr.msk.f32.mxu0 %vm2259_vm1, %v2260_v30 }
 0xac0   : > { %1903 = vmatprep.subr.bf16.mxu0 %v2258_v21 }
 0xac3   : > { %1905 = vmatpush3.bf16.msra.mxu0 %v2536_v33 }
 0xac6   : > { %1827 = vmatmul.mubr.msk.f32.vlgmr.msra.gmra.mrb[6].mxu0 %vm398_vm2, %v1215_v40 }
 0xb80   : > { %v1284_v7 = vpop.f32.mrb[6].mxu1 }
 0xb81   : > { %1465 = vst [vmem:[#allocation4] sm:$0xf] %v1284_v7  ;;  %v1817_v42 = vpop.f32.mrb[7].mxu1 }
 0xb99   : > { %v1354_v43 = vpop.f32.mrb[6].mxu0 }
 0xb9a   : > { %v1914_v9 = vadd.f32 %v2606_v27, %v1354_v43  ;;  %v1828_v44 = vpop.f32.mrb[7].mxu0 }
 0xb9c   : > { %2082 = vtanh.f32 %v1914_v9  ;;  %v1641_v26 = vmul.f32 -1.442695, %v1914_v9 }
 0xb9e   : > { %2084 = vpow2.f32 %v1641_v26 }
 0xba6   : > { %v2083_v45 = vpop.eup %2082 }
 0xba7   : > { %1367 = vrot.lane.b32.xlu0 %v2083_v45, %s2256_s27 }
 0xba8   : > { %v2085_v30 = vpop.eup %2084 }
 0xba9   : > { %v1361_v46 = vadd.f32 1.0, %v2085_v30 }
 0xbab   : > { %2086 = vrcp.f32 %v1361_v46 }
 0xbb5   : > { %v2087_v21 = vpop.eup %2086 }
 0xbb6   : > { %v1365_v48 = vmul.f32 %v2087_v21, %v1104_v34 }
 0xc19   : > { %v1368_v33 = vpop.permute.xlu0 %1367 }
 0xc1a   : > { %v1370_v47 = vmul.f32 %v2087_v21, %v1368_v33 }
 0xc1c   : > { %1372 = vrot.lane.b32.xlu1 %v1370_v47, %s2257_s7 }
 0xc8e   : > { %v1373_v49 = vpop.permute.xlu1 %1372 }
 0xc8f   : > { %v1375_v50 = vadd.f32 %v1373_v49, %v1365_v48 }
 0xc91   : > { %2088 = vtanh.f32 %v1375_v50 }
 0xc9b   : > { %v2089_v51 = vpop.eup %2088 }
 0xc9c   : > { %1378 = vrot.lane.b32.xlu0 %v2089_v51, %s2256_s27 }
 0xca0   : > { %1461 = vrot.lane.b32.xlu0 %v1206_v24, %s2261_s21 }
 0xca4   : > { %1484 = vrot.lane.b32.xlu0 (!%p1643_p1), %v2518_v18, %s2262_s11 }
 0xd0e   : > { %v1379_v52 = vpop.permute.xlu0 %1378 }
 0xd0f   : > { %v1381_v53 = vmul.f32 %v2087_v21, %v1379_v52 }
 0xd11   : > { %1383 = vrot.lane.b32.xlu1 %v1381_v53, %s2257_s7 }
 0xd12   : > { %v1462_v54 = vpop.permute.xlu0 %1461 }
 0xd13   : > { %1464 = vst.msk [vmem:[#allocation3] sm:$0xf] %vm1458_vm3, %v1462_v54 }
 0xd15   : > { %1470 = vrot.lane.b32.xlu1 %v1375_v50, %s2261_s21 }
 0xd16   : > { %v1485_v60 = vpop.permute.xlu0 (!%p1643_p1), %1484 }
 0xd17   : > { %v1487_v61 = vmul.f32 (!%p1643_p1), %v1485_v60, %v1381_v53 }
 0xd19   : > { %1489 = vrot.lane.b32.xlu0 (!%p1643_p1), %v1487_v61, %s2263_s22 }
 0xd83   : > { %v1384_v55 = vpop.permute.xlu1 %1383 }
 0xd84   : > { %1838 = vmatmul.mubr.msk.f32.vlgmr.msra.gmra.mrb[8].mxu1 %vm398_vm2, %v1384_v55 }
 0xd87   : > { %v1471_v56 = vpop.permute.xlu1 %1470 }
 0xd88   : > { %1473 = vst.msk [vmem:[#allocation3 + $0x4] sm:$0xf] %vm1458_vm3, %v1471_v56 }
 0xd8b   : > { %v1490_v62 = vpop.permute.xlu0 (!%p1643_p1), %1489 }
 0xd8c   : > { %v1492_v63 = vsel (!%p1643_p1), %vm1458_vm3, %v1490_v62, 0.0 }
 0xd8d   : > { %1493 = vadd.xlane.f32.xlu1 (!%p1643_p1), %v1492_v63 }
 0xe1a   : > { %v1494_v0 = vpop.xlane.xlu1 (!%p1643_p1), %1493 }
 0xe54   : > { %1478 = sbr.rel (%p1643_p1) target bundleno = 3675 (0xe5b), region = 64 }
 0xe57   : > { %v1453_v57 = vpop.f32.mrb[8].mxu1 }
 0xe58   : > { %v1454_v58 = vadd.f32 %v2606_v27, %v1453_v57  ;;  %v1839_v59 = vpop.f32.mrb[9].mxu1  ;;  %v1501_v27 = vadd.f32 (!%p1643_p1), %v2520_v19, %v1494_v0 }
 0xe5a   : > { %1474 = vst [vmem:[#allocation4 + $0x4] sm:$0xf] %v1454_v58  ;;  %1503 = vst.msk [vmem:[%s2502_s16] sm:$0xf] (!%p1643_p1), %vm1502_vm4, %v1501_v27 }
 0xe5b PF: > { %s22_s30 = sadd.s32 1, %s2246_s30   ;;  %s2737_s2 = sld [smem:[#allocation13_spill]] }
 0xe5c   : > { %p19_p4 = scmp.ge.s32.totalorder %s22_s30, 6   ;;  %s2738_s23 = smov %s2222_s24 }
 0xe5d   : > { %s2739_s24 = smov %s2226_s25  ;;  %s2740_s25 = smov %s2439_s1 }
 0xe5e   : > { %s2741_s26 = smov %s2238_s28  ;;  %s2742_s27 = smov %s2242_s29 }
 0xe5f   : > { %s2744_s29 = smov %s2750_s15  ;;  %21 = sbr.rel (!%p19_p4) target bundleno = 10 (0xa), region = 108 }
 0xe61   : > { %s2743_s28 = smov %s2737_s2 }
 0xe66   :  { %1523 = vsyncpa [#allocation7], 1 }
 0xe67   :  { %1525 = vsyncpa [#allocation7 + $0x1], 1 }
 0xe68   :  { %1526 = vsyncpa [#allocation9], 1 }

</bundles_post_ra>
